<compile_context>
chip_gen: v5e
topology: v5e:2x2
jax: 0.10.0
libtpu: 0.0.40
codegen_flags: <defaults>
</compile_context>

<pallas_src>
import math

import jax
import jax.numpy as jnp
from jax.experimental import pallas as pl
from jax.experimental.pallas import tpu as pltpu

PAD_WIDTH = 128          # lane-dense padded width for every hidden layer + logits
BIAS_SLOT = 128          # 128-lane-aligned slot per layer in the packed bias
NEG_INF = -1e30          # fill value for padded logit lanes (fits in bf16)
MAX_TB = 2048            # max batch tile (VMEM is nowhere near tight at this size)


def make_mlp_kernel(n_layers):
    """Fused 6-layer MLP: bf16 MXU matmuls, f32 elementwise, f32 log_softmax."""

    def mlp_kernel(x_ref, w1, w2, w3, w4, w5, w6, b_ref, out_ref):
        w_refs = (w1, w2, w3, w4, w5, w6)
        h = x_ref[...]                                            # (TB, d_in) bf16
        z = None
        for i in range(n_layers):
            # Folded BN is already inside W/b; Dropout is identity in eval mode.
            bias = b_ref[:, i * BIAS_SLOT:(i + 1) * BIAS_SLOT]    # (1, 128) f32
            z = jnp.dot(h, w_refs[i][...],
                        preferred_element_type=jnp.float32) + bias
            if i < n_layers - 1:
                # ReLU in f32 (v5e-safe); bf16 only to feed the next MXU matmul.
                h = jnp.maximum(z, 0.0).astype(jnp.bfloat16)

        # log_softmax over the 128 padded lanes. Padded lanes carry ~-1e30
        # logits -> exp underflows to 0 and they do not perturb the logsumexp.
        m = jnp.max(z, axis=-1, keepdims=True)
        s = z - m
        lse = jnp.log(jnp.sum(jnp.exp(s), axis=-1, keepdims=True))
        out_ref[...] = (s - lse).astype(out_ref.dtype)            # bf16 store

    return mlp_kernel


def make_params(key, dims, dtype=jnp.float32):
    """Deterministic parameters mirroring the PyTorch module, with BatchNorm
    folded into each Linear (eval mode). Returns list of (W_folded, b_folded),
    W_folded of shape (d_in, d_out), f32."""
    eps = 1e-5
    params = []
    for i in range(6):
        d_in, d_out = dims[i], dims[i + 1]
        key, kw, kb, kg, kbeta, km, kv = jax.random.split(key, 7)

        # kaiming_normal_ (fan_in, relu gain): std = sqrt(2 / fan_in)
        w = jax.random.normal(kw, (d_out, d_in), dtype) * math.sqrt(2.0 / d_in)
        # nn.Linear default bias init: U(-1/sqrt(fan_in), 1/sqrt(fan_in))
        bound = 1.0 / math.sqrt(d_in)
        b = jax.random.uniform(kb, (d_out,), dtype, -bound, bound)

        # BatchNorm1d params / running stats (deterministic, non-trivial).
        gamma = 1.0 + 0.1 * jax.random.normal(kg, (d_in,), dtype)
        beta = 0.1 * jax.random.normal(kbeta, (d_in,), dtype)
        run_mean = 0.1 * jax.random.normal(km, (d_in,), dtype)
        run_var = 1.0 + 0.1 * jax.random.uniform(kv, (d_in,), dtype)

        # BN eval: y = x*scale + shift; fold into the linear:
        #   (x*scale + shift) @ W^T + b = x @ (scale[:,None]*W^T) + (shift@W^T + b)
        scale = gamma / jnp.sqrt(run_var + eps)
        shift = beta - run_mean * scale
        wt = w.T                                   # (d_in, d_out)
        params.append((scale[:, None] * wt, shift @ wt + b))
    return params


def pack_for_kernel(params, pad=PAD_WIDTH):
    """Pack folded params for the kernel:
    - bf16 weights, every layer's output (and layers>=1 input) zero-padded to
      `pad` lanes so all tiles are lane-aligned,
    - one packed f32 bias array with 128-lane slots; padded lanes are 0 for
      hidden layers (zero columns -> zero activations) and -1e30 for the final
      layer so padded logits vanish in the logsumexp."""
    n = len(params)
    weights = []
    bias_packed = jnp.zeros((1, BIAS_SLOT * n), jnp.float32)
    for i, (w, b) in enumerate(params):
        d_in, d_out = w.shape
        p_in = d_in if i == 0 else pad
        w_p = jnp.zeros((p_in, pad), jnp.float32).at[:d_in, :d_out].set(w)
        weights.append(w_p.astype(jnp.bfloat16))

        slot_fill = NEG_INF if i == n - 1 else 0.0
        slot = jnp.full((pad,), slot_fill, jnp.float32).at[:d_out].set(b)
        bias_packed = bias_packed.at[0, i * BIAS_SLOT:(i + 1) * BIAS_SLOT].set(slot)
    return weights, bias_packed


def _round_up(x, m):
    return ((x + m - 1) // m) * m


def _pick_batch_tile(B):
    """Large tiles (<=2048) to amortize per-step overhead; for B>256 force at
    least 2 grid steps so v7x's two TensorCores both get work."""
    if B <= 256:
        return B
    return min(MAX_TB, _round_up((B + 1) // 2, 256))


@jax.jit
def nn_forward(x, weights, bias_packed):
    """Returns padded (B, 128) bf16 log-probs. Real classes occupy lanes
    [:num_classes]; consumers should index lazily (avoids an extra HBM pass)."""
    B, d_in = x.shape
    x = x.astype(jnp.bfloat16)      # no-op if the caller already passes bf16

    TB = _pick_batch_tile(B)
    n_steps = pl.cdiv(B, TB)
    kernel = make_mlp_kernel(len(weights))
    out_shape = jax.ShapeDtypeStruct((B, PAD_WIDTH), jnp.bfloat16)

    if n_steps == 1:
        # Tiny case: nothing to pipeline or shard -> no grid machinery at all,
        # whole arrays live in VMEM for the single invocation.
        return pl.pallas_call(kernel, out_shape=out_shape)(x, *weights, bias_packed)

    in_specs = [pl.BlockSpec((TB, d_in), lambda i: (i, 0))]
    in_specs += [pl.BlockSpec(w.shape, lambda i: (0, 0)) for w in weights]
    in_specs.append(pl.BlockSpec(bias_packed.shape, lambda i: (0, 0)))

    return pl.pallas_call(
        kernel,
        out_shape=out_shape,
        grid=(n_steps,),
        in_specs=in_specs,
        out_specs=pl.BlockSpec((TB, PAD_WIDTH), lambda i: (i, 0)),
        compiler_params=pltpu.CompilerParams(
            dimension_semantics=("parallel",)),
    )(x, *weights, bias_packed)


def nn_forward_ref(x, params):
    """Pure-JAX reference with the same bf16-matmul / f32-elementwise recipe."""
    h = x.astype(jnp.bfloat16)
    n = len(params)
    z = None
    for i, (w, b) in enumerate(params):
        z = jnp.dot(h, w.astype(jnp.bfloat16),
                    preferred_element_type=jnp.float32) + b
        if i < n - 1:
            h = jnp.maximum(z, 0.0).astype(jnp.bfloat16)
    return jax.nn.log_softmax(z, axis=1)


def _check(batch, dims, params, weights, bias_packed, key):
    x = jax.random.normal(key, (batch, dims[0]), jnp.float32)
    out_pad = nn_forward(x.astype(jnp.bfloat16), weights, bias_packed)
    out_pad = jax.block_until_ready(out_pad)
    assert out_pad.shape == (batch, PAD_WIDTH)

    num_classes = dims[-1]
    got = out_pad[:, :num_classes].astype(jnp.float32)      # lazy consumer slice
    ref = nn_forward_ref(x, params)
    ref = ref.astype(jnp.bfloat16).astype(jnp.float32)       # match bf16 output
    assert got.shape == (batch, num_classes)
    assert jnp.allclose(got, ref, atol=2e-2, rtol=2e-2), "mismatch vs reference"


if __name__ == "__main__":
    # dims for the 7-wide MLP: [in, h1, h2, h3, h4, h5, out]
    dims = [32, 64, 64, 48, 48, 32, 16]

    key = jax.random.PRNGKey(0)
    key, kx1, kx2 = jax.random.split(key, 3)

    # TODO(synk): training-mode BatchNorm (batch statistics) and active Dropout
    # are not implemented; this is the eval-mode forward pass.
    params = make_params(key, dims)
    weights, bias_packed = pack_for_kernel(params)

    # Small single-tile case (grid dropped entirely).
    _check(8, dims, params, weights, bias_packed, kx1)
    # Multi-tile case with a partial last block (grid=(2,), "parallel").
    _check(520, dims, params, weights, bias_packed, kx2)

    print("KERNEL_OK")
</pallas_src>

<mosaic_0001>
module attributes {stable_mosaic.version = 11 : i64} {
  func.func @mlp_kernel(%arg0: memref<8x32xbf16, #tpu.memory_space<vmem>>, %arg1: memref<32x128xbf16, #tpu.memory_space<vmem>>, %arg2: memref<128x128xbf16, #tpu.memory_space<vmem>>, %arg3: memref<128x128xbf16, #tpu.memory_space<vmem>>, %arg4: memref<128x128xbf16, #tpu.memory_space<vmem>>, %arg5: memref<128x128xbf16, #tpu.memory_space<vmem>>, %arg6: memref<128x128xbf16, #tpu.memory_space<vmem>>, %arg7: memref<1x768xf32, #tpu.memory_space<vmem>>, %arg8: memref<8x128xbf16, #tpu.memory_space<vmem>>) attributes {dimension_semantics = [], scalar_prefetch = 0 : i64, scratch_operands = 0 : i64, tpu.core_type = #tpu.core_type<tc>} {
    %c0 = arith.constant 0 : index
    %c0_0 = arith.constant 0 : index
    %0 = vector.load %arg0[%c0, %c0_0] : memref<8x32xbf16, #tpu.memory_space<vmem>>, vector<8x32xbf16>
    %c0_1 = arith.constant 0 : index
    %c0_2 = arith.constant 0 : index
    %1 = vector.load %arg7[%c0_1, %c0_2] : memref<1x768xf32, #tpu.memory_space<vmem>>, vector<1x128xf32>
    %c0_3 = arith.constant 0 : index
    %c0_4 = arith.constant 0 : index
    %2 = vector.load %arg1[%c0_3, %c0_4] : memref<32x128xbf16, #tpu.memory_space<vmem>>, vector<32x128xbf16>
    %cst = arith.constant dense<0.000000e+00> : vector<8x128xf32>
    %3 = tpu.matmul %0, %2, %cst {dimension_numbers = #tpu.dot_dimension_numbers<[1], [0], [0], [1], [0, 0, 1, 1], [], []>} : vector<8x32xbf16>, vector<32x128xbf16>, vector<8x128xf32> -> vector<8x128xf32>
    %4 = vector.broadcast %1 : vector<1x128xf32> to vector<8x128xf32>
    %5 = arith.addf %3, %4 : vector<8x128xf32>
    %cst_5 = arith.constant 0.000000e+00 : f32
    %6 = vector.broadcast %cst_5 : f32 to vector<8x128xf32>
    %7 = arith.maximumf %5, %6 : vector<8x128xf32>
    %8 = arith.truncf %7 : vector<8x128xf32> to vector<8x128xbf16>
    %c0_6 = arith.constant 0 : index
    %c128 = arith.constant 128 : index
    %9 = vector.load %arg7[%c0_6, %c128] : memref<1x768xf32, #tpu.memory_space<vmem>>, vector<1x128xf32>
    %c0_7 = arith.constant 0 : index
    %c0_8 = arith.constant 0 : index
    %10 = vector.load %arg2[%c0_7, %c0_8] : memref<128x128xbf16, #tpu.memory_space<vmem>>, vector<128x128xbf16>
    %cst_9 = arith.constant dense<0.000000e+00> : vector<8x128xf32>
    %11 = tpu.matmul %8, %10, %cst_9 {dimension_numbers = #tpu.dot_dimension_numbers<[1], [0], [0], [1], [0, 0, 1, 1], [], []>} : vector<8x128xbf16>, vector<128x128xbf16>, vector<8x128xf32> -> vector<8x128xf32>
    %12 = vector.broadcast %9 : vector<1x128xf32> to vector<8x128xf32>
    %13 = arith.addf %11, %12 : vector<8x128xf32>
    %cst_10 = arith.constant 0.000000e+00 : f32
    %14 = vector.broadcast %cst_10 : f32 to vector<8x128xf32>
    %15 = arith.maximumf %13, %14 : vector<8x128xf32>
    %16 = arith.truncf %15 : vector<8x128xf32> to vector<8x128xbf16>
    %c0_11 = arith.constant 0 : index
    %c256 = arith.constant 256 : index
    %17 = vector.load %arg7[%c0_11, %c256] : memref<1x768xf32, #tpu.memory_space<vmem>>, vector<1x128xf32>
    %c0_12 = arith.constant 0 : index
    %c0_13 = arith.constant 0 : index
    %18 = vector.load %arg3[%c0_12, %c0_13] : memref<128x128xbf16, #tpu.memory_space<vmem>>, vector<128x128xbf16>
    %cst_14 = arith.constant dense<0.000000e+00> : vector<8x128xf32>
    %19 = tpu.matmul %16, %18, %cst_14 {dimension_numbers = #tpu.dot_dimension_numbers<[1], [0], [0], [1], [0, 0, 1, 1], [], []>} : vector<8x128xbf16>, vector<128x128xbf16>, vector<8x128xf32> -> vector<8x128xf32>
    %20 = vector.broadcast %17 : vector<1x128xf32> to vector<8x128xf32>
    %21 = arith.addf %19, %20 : vector<8x128xf32>
    %cst_15 = arith.constant 0.000000e+00 : f32
    %22 = vector.broadcast %cst_15 : f32 to vector<8x128xf32>
    %23 = arith.maximumf %21, %22 : vector<8x128xf32>
    %24 = arith.truncf %23 : vector<8x128xf32> to vector<8x128xbf16>
    %c0_16 = arith.constant 0 : index
    %c384 = arith.constant 384 : index
    %25 = vector.load %arg7[%c0_16, %c384] : memref<1x768xf32, #tpu.memory_space<vmem>>, vector<1x128xf32>
    %c0_17 = arith.constant 0 : index
    %c0_18 = arith.constant 0 : index
    %26 = vector.load %arg4[%c0_17, %c0_18] : memref<128x128xbf16, #tpu.memory_space<vmem>>, vector<128x128xbf16>
    %cst_19 = arith.constant dense<0.000000e+00> : vector<8x128xf32>
    %27 = tpu.matmul %24, %26, %cst_19 {dimension_numbers = #tpu.dot_dimension_numbers<[1], [0], [0], [1], [0, 0, 1, 1], [], []>} : vector<8x128xbf16>, vector<128x128xbf16>, vector<8x128xf32> -> vector<8x128xf32>
    %28 = vector.broadcast %25 : vector<1x128xf32> to vector<8x128xf32>
    %29 = arith.addf %27, %28 : vector<8x128xf32>
    %cst_20 = arith.constant 0.000000e+00 : f32
    %30 = vector.broadcast %cst_20 : f32 to vector<8x128xf32>
    %31 = arith.maximumf %29, %30 : vector<8x128xf32>
    %32 = arith.truncf %31 : vector<8x128xf32> to vector<8x128xbf16>
    %c0_21 = arith.constant 0 : index
    %c512 = arith.constant 512 : index
    %33 = vector.load %arg7[%c0_21, %c512] : memref<1x768xf32, #tpu.memory_space<vmem>>, vector<1x128xf32>
    %c0_22 = arith.constant 0 : index
    %c0_23 = arith.constant 0 : index
    %34 = vector.load %arg5[%c0_22, %c0_23] : memref<128x128xbf16, #tpu.memory_space<vmem>>, vector<128x128xbf16>
    %cst_24 = arith.constant dense<0.000000e+00> : vector<8x128xf32>
    %35 = tpu.matmul %32, %34, %cst_24 {dimension_numbers = #tpu.dot_dimension_numbers<[1], [0], [0], [1], [0, 0, 1, 1], [], []>} : vector<8x128xbf16>, vector<128x128xbf16>, vector<8x128xf32> -> vector<8x128xf32>
    %36 = vector.broadcast %33 : vector<1x128xf32> to vector<8x128xf32>
    %37 = arith.addf %35, %36 : vector<8x128xf32>
    %cst_25 = arith.constant 0.000000e+00 : f32
    %38 = vector.broadcast %cst_25 : f32 to vector<8x128xf32>
    %39 = arith.maximumf %37, %38 : vector<8x128xf32>
    %40 = arith.truncf %39 : vector<8x128xf32> to vector<8x128xbf16>
    %c0_26 = arith.constant 0 : index
    %c640 = arith.constant 640 : index
    %41 = vector.load %arg7[%c0_26, %c640] : memref<1x768xf32, #tpu.memory_space<vmem>>, vector<1x128xf32>
    %c0_27 = arith.constant 0 : index
    %c0_28 = arith.constant 0 : index
    %42 = vector.load %arg6[%c0_27, %c0_28] : memref<128x128xbf16, #tpu.memory_space<vmem>>, vector<128x128xbf16>
    %cst_29 = arith.constant dense<0.000000e+00> : vector<8x128xf32>
    %43 = tpu.matmul %40, %42, %cst_29 {dimension_numbers = #tpu.dot_dimension_numbers<[1], [0], [0], [1], [0, 0, 1, 1], [], []>} : vector<8x128xbf16>, vector<128x128xbf16>, vector<8x128xf32> -> vector<8x128xf32>
    %44 = vector.broadcast %41 : vector<1x128xf32> to vector<8x128xf32>
    %45 = arith.addf %43, %44 : vector<8x128xf32>
    %cst_30 = arith.constant dense<0xFF800000> : vector<8xf32>
    %46 = vector.multi_reduction <maximumf>, %45, %cst_30 [1] : vector<8x128xf32> to vector<8xf32>
    %47 = vector.shape_cast %46 : vector<8xf32> to vector<8x1xf32>
    %48 = vector.broadcast %47 : vector<8x1xf32> to vector<8x128xf32>
    %49 = arith.subf %45, %48 : vector<8x128xf32>
    %50 = math.exp %49 : vector<8x128xf32>
    %cst_31 = arith.constant dense<0.000000e+00> : vector<8xf32>
    %51 = vector.multi_reduction <add>, %50, %cst_31 [1] : vector<8x128xf32> to vector<8xf32>
    %52 = vector.shape_cast %51 : vector<8xf32> to vector<8x1xf32>
    %53 = math.log %52 : vector<8x1xf32>
    %54 = vector.broadcast %53 : vector<8x1xf32> to vector<8x128xf32>
    %55 = arith.subf %49, %54 : vector<8x128xf32>
    %56 = arith.truncf %55 : vector<8x128xf32> to vector<8x128xbf16>
    %c0_32 = arith.constant 0 : index
    %c0_33 = arith.constant 0 : index
    %57 = vector.load %arg8[%c0_32, %c0_33] : memref<8x128xbf16, #tpu.memory_space<vmem>>, vector<8x128xbf16>
    tpu.vector_store %arg8[%c0_32, %c0_33], %56 {strides = array<i32>} : memref<8x128xbf16, #tpu.memory_space<vmem>>, vector<8x128xbf16>,
    return
  }
}

</mosaic_0001>

<bundles_post_ra>
// kernel: nn_forward.1
= control target key start
LH: loop header
LB: loop body
LE: loop exit
PB: predicated region body
PF: predicated region fallthrough
CT: control target
= control target key end

     0   :  { %13 = vsyncpa [#allocation3], 0  ;;  %s1171_s0 = inlined_call_operand.hbm [shape: bf16[8,32], index: 0, kind: input, shape index: {}]   ;;  %s1172_s1 = inlined_call_operand.hbm [shape: bf16[32,128], index: 1, kind: input, shape index: {}]   ;;  %s1173_s2 = inlined_call_operand.hbm [shape: bf16[128,128], index: 2, kind: input, shape index: {}]   ;;  %s1174_s3 = inlined_call_operand.hbm [shape: bf16[128,128], index: 3, kind: input, shape index: {}]   ;;  %s1175_s4 = inlined_call_operand.hbm [shape: bf16[128,128], index: 4, kind: input, shape index: {}]   ;;  %s1176_s5 = inlined_call_operand.hbm [shape: bf16[128,128], index: 5, kind: input, shape index: {}]   ;;  %s1177_s6 = inlined_call_operand.hbm [shape: bf16[128,128], index: 6, kind: input, shape index: {}]   ;;  %s1178_s7 = inlined_call_operand.vmem [shape: f32[1,768], index: 7, kind: input, shape index: {}]   ;;  %s1179_s8 = inlined_call_operand.hbm [shape: bf16[8,128], index: 8, kind: output, shape index: {}]  }
   0x1   :  { %14 = vsyncpa [#allocation6], 0 }
   0x2   :  { %15 = vsyncpa [#allocation9], 0 }
   0x3   :  { %16 = vsyncpa [#allocation12], 0  ;;  %s33_s29 = sshll.u32 %s1172_s1, 4  ;;  %s34_s29 = int_to_ptr.hbm [resolvable:$true] %s33_s29 }
   0x4   :  { %17 = vsyncpa [#allocation4], 0  ;;  %s1056_s30 = smov [#allocation5]   ;;  %s59_s12 = sshll.u32 %s1174_s3, 4  ;;  %s60_s12 = int_to_ptr.hbm [resolvable:$true] %s59_s12 }
   0x5   :  { %s35_s9 = sshll.u32 %s1056_s30, 4  ;;  %s1057_s13 = smov 64   ;;  %s36_s9 = int_to_ptr.vmem [resolvable:$true] %s35_s9 }
   0x6   :  { %s1058_s14 = smov 4   ;;  %s1059_s15 = smov [#allocation8]  }
   0x7   :  { %41 = dma.hbm_to_vmem [thread:$0]  %s34_s29, 256, %s36_s9, [#allocation6], %s1057_s13, %s1057_s13, %s1058_s14  }
   0x8   :  { %s61_s16 = sshll.u32 %s1059_s15, 4  ;;  %s85_s18 = sshll.u32 %s1176_s5, 4  ;;  %s62_s16 = int_to_ptr.vmem [resolvable:$true] %s61_s16  ;;  %s86_s18 = int_to_ptr.hbm [resolvable:$true] %s85_s18 }
   0x9   :  { %67 = dma.hbm_to_vmem [thread:$0]  %s60_s12, 1024, %s62_s16, [#allocation9], %s1057_s13, %s1057_s13, %s1058_s14  }
   0xa   :  { %s23_s20 = sshll.u32 %s1171_s0, 4  ;;  %s1060_s21 = smov [#allocation11]   ;;  %s24_s20 = int_to_ptr.hbm [resolvable:$true] %s23_s20 }
   0xb   :  { %s87_s22 = sshll.u32 %s1060_s21, 4  ;;  %s1061_s23 = smov [#allocation2]   ;;  %s88_s22 = int_to_ptr.vmem [resolvable:$true] %s87_s22 }
   0xc   :  { %93 = dma.hbm_to_vmem [thread:$0]  %s86_s18, 1024, %s88_s22, [#allocation12], %s1057_s13, %s1057_s13, %s1058_s14  }
   0xd   :  { %s25_s5 = sshll.u32 %s1061_s23, 4  ;;  %s46_s26 = sshll.u32 %s1173_s2, 4  ;;  %s26_s5 = int_to_ptr.vmem [resolvable:$true] %s25_s5  ;;  %s47_s26 = int_to_ptr.hbm [resolvable:$true] %s46_s26 }
   0xe   :  { %28 = dma.hbm_to_vmem [thread:$0]  %s24_s20, 64, %s26_s5, [#allocation3]  }
   0xf   :  { %s72_s0 = sshll.u32 %s1175_s4, 4  ;;  %s1062_s29 = smov [#allocation7]   ;;  %s73_s0 = int_to_ptr.hbm [resolvable:$true] %s72_s0 }
  0x10   :  { %s48_s30 = sshll.u32 %s1062_s29, 4  ;;  %s1063_s9 = smov [#allocation10]   ;;  %s49_s30 = int_to_ptr.vmem [resolvable:$true] %s48_s30 }
  0x11   :  { %54 = dma.hbm_to_vmem [thread:$0]  %s47_s26, 1024, %s49_s30, [#allocation6], %s1057_s13, %s1057_s13, %s1058_s14  }
  0x12   :  { %s74_s10 = sshll.u32 %s1063_s9, 4  ;;  %s98_s2 = sshll.u32 %s1177_s6, 4  ;;  %s75_s10 = int_to_ptr.vmem [resolvable:$true] %s74_s10  ;;  %s99_s2 = int_to_ptr.hbm [resolvable:$true] %s98_s2 }
  0x13   :  { %80 = dma.hbm_to_vmem [thread:$0]  %s73_s0, 1024, %s75_s10, [#allocation9], %s1057_s13, %s1057_s13, %s1058_s14  }
  0x14   :  { %s1064_s4 = smov [#allocation13]  }
  0x15   :  { %s100_s15 = sshll.u32 %s1064_s4, 4  ;;  %s101_s15 = int_to_ptr.vmem [resolvable:$true] %s100_s15 }
  0x16   :  { %106 = dma.hbm_to_vmem [thread:$0]  %s99_s2, 1024, %s101_s15, [#allocation12], %s1057_s13, %s1057_s13, %s1058_s14  }
  0x17   :  { %1046 = dma.done.wait [#allocation3], 64  }
  0x18   :  { %1047 = vsyncadd [#allocation3], 4294967232 }
  0x19   :  { %1048 = dma.done.wait [#allocation6], 1280  }
  0x1a   :  { %1049 = vsyncadd [#allocation6], 4294966016 }
  0x1b   :  { %1050 = dma.done.wait [#allocation9], 2048  }
  0x1c   :  { %1051 = vsyncadd [#allocation9], 4294965248 }
  0x1d   :  { %1052 = dma.done.wait [#allocation12], 2048  }
  0x1e   :  { %1053 = vsyncadd [#allocation12], 4294965248  ;;  %v793_v0 = vld [vmem:[#allocation5 + $0x8] sm:$0xff]  ;;  %v792_v2 = vld [vmem:[#allocation5] sm:$0xff]  ;;  %vm159_vm0 = vcmask 261120   ;;  %s1065_s23 = smov [#allocation14]  }
  0x1f   :  { %v801_v1 = vld [vmem:[#allocation7 + $0x38] sm:$0xff]  ;;  %169 = vmatpush.bf16.msra.mxu0 %v793_v0  ;;  %v800_v3 = vld [vmem:[#allocation7 + $0x30] sm:$0xff]  ;;  %v138_v4 = vld [vmem:[#allocation2] sm:$0xf]  ;;  %s608_s5 = sshll.u32 %s1065_s23, 4  ;;  %s609_s5 = int_to_ptr.vmem [resolvable:$true] %s608_s5 }
  0x20   :  { %246 = vmatpush.bf16.msra.mxu1 %v801_v1  ;;  %v799_v5 = vld [vmem:[#allocation7 + $0x28] sm:$0xff]  ;;  %v798_v6 = vld [vmem:[#allocation7 + $0x20] sm:$0xff]  ;;  %v797_v7 = vld [vmem:[#allocation7 + $0x18] sm:$0xff] }
  0x21   :  { %v796_v8 = vld [vmem:[#allocation7 + $0x10] sm:$0xff]  ;;  %v795_v9 = vld [vmem:[#allocation7 + $0x8] sm:$0xff]  ;;  %v794_v10 = vld [vmem:[#allocation7] sm:$0xff] }
  0x22   :  { %v809_v11 = vld [vmem:[#allocation8 + $0x38] sm:$0xff]  ;;  %v808_v12 = vld [vmem:[#allocation8 + $0x30] sm:$0xff]  ;;  %v807_v13 = vld [vmem:[#allocation8 + $0x28] sm:$0xff] }
  0x23   :  { %170 = vmatpush.bf16.msra.mxu0 %v792_v2  ;;  %329 = vmatpush.bf16.msra.mxu2 %v809_v11  ;;  %v806_v14 = vld [vmem:[#allocation8 + $0x20] sm:$0xff]  ;;  %v805_v15 = vld [vmem:[#allocation8 + $0x18] sm:$0xff]  ;;  %v804_v16 = vld [vmem:[#allocation8 + $0x10] sm:$0xff] }
  0x24   :  { %247 = vmatpush.bf16.msra.mxu1 %v800_v3  ;;  %v844_v17 = vld [vmem:[%s1178_s7] ss:$0 sm:$0xff]  ;;  %v802_v24 = vld [vmem:[#allocation8] sm:$0xff]  ;;  %v817_v25 = vld [vmem:[#allocation10 + $0x38] sm:$0xff] }
  0x25   :  { %v803_v23 = vld [vmem:[#allocation8 + $0x8] sm:$0xff]  ;;  %412 = vmatpush.bf16.msra.mxu3 %v817_v25  ;;  %v816_v26 = vld [vmem:[#allocation10 + $0x30] sm:$0xff]  ;;  %v814_v28 = vld [vmem:[#allocation10 + $0x20] sm:$0xff] }
  0x26   :  { %631 = vmatmul.msk.bf16.vlgmr.msra.gmra.mxu0 %vm159_vm0, %v138_v4  ;;  %v815_v27 = vld [vmem:[#allocation10 + $0x28] sm:$0xff]  ;;  %v813_v29 = vld [vmem:[#allocation10 + $0x18] sm:$0xff]  ;;  %v812_v30 = vld [vmem:[#allocation10 + $0x10] sm:$0xff] }
  0x27   :  { %330 = vmatpush.bf16.msra.mxu2 %v808_v12  ;;  %v845_v31 = vld [vmem:[%s1178_s7 + $0x1] ss:$0 sm:$0xff]  ;;  %v810_v38 = vld [vmem:[#allocation10] sm:$0xff]  ;;  %v825_v39 = vld [vmem:[#allocation11 + $0x38] sm:$0xff] }
  0x28   :  { %248 = vmatpush.bf16.msra.mxu1 %v799_v5  ;;  %v811_v37 = vld [vmem:[#allocation10 + $0x8] sm:$0xff]  ;;  %495 = vmatpush.bf16.msrb.mxu0 %v825_v39  ;;  %v824_v40 = vld [vmem:[#allocation11 + $0x30] sm:$0xff]  ;;  %v822_v42 = vld [vmem:[#allocation11 + $0x20] sm:$0xff] }
  0x29   :  { %413 = vmatpush.bf16.msra.mxu3 %v816_v26  ;;  %v823_v41 = vld [vmem:[#allocation11 + $0x28] sm:$0xff]  ;;  %v821_v43 = vld [vmem:[#allocation11 + $0x18] sm:$0xff]  ;;  %v820_v44 = vld [vmem:[#allocation11 + $0x10] sm:$0xff] }
  0x2a   :  { %v846_v45 = vld [vmem:[%s1178_s7 + $0x2] ss:$0 sm:$0xff]  ;;  %v818_v52 = vld [vmem:[#allocation11] sm:$0xff]  ;;  %v833_v53 = vld [vmem:[#allocation13 + $0x38] sm:$0xff] }
  0x2b   :  { %331 = vmatpush.bf16.msra.mxu2 %v807_v13  ;;  %v819_v51 = vld [vmem:[#allocation11 + $0x8] sm:$0xff]  ;;  %v832_v54 = vld [vmem:[#allocation13 + $0x30] sm:$0xff]  ;;  %v830_v56 = vld [vmem:[#allocation13 + $0x20] sm:$0xff] }
  0x2c   :  { %249 = vmatpush.bf16.msra.mxu1 %v798_v6  ;;  %496 = vmatpush.bf16.msrb.mxu0 %v824_v40  ;;  %v831_v55 = vld [vmem:[#allocation13 + $0x28] sm:$0xff]  ;;  %v829_v57 = vld [vmem:[#allocation13 + $0x18] sm:$0xff]  ;;  %v828_v58 = vld [vmem:[#allocation13 + $0x10] sm:$0xff] }
  0x2d   :  { %414 = vmatpush.bf16.msra.mxu3 %v815_v27  ;;  %v847_v59 = vld [vmem:[%s1178_s7 + $0x3] ss:$0 sm:$0xff]  ;;  %v826_v2 = vld [vmem:[#allocation13] sm:$0xff]  ;;  %v848_v3 = vld [vmem:[%s1178_s7 + $0x4] ss:$0 sm:$0xff] }
  0x2e   :  { %v827_v1 = vld [vmem:[#allocation13 + $0x8] sm:$0xff] }
  0x2f   :  { %332 = vmatpush.bf16.msra.mxu2 %v806_v14 }
  0x30   :  { %250 = vmatpush.bf16.msra.mxu1 %v797_v7  ;;  %497 = vmatpush.bf16.msrb.mxu0 %v823_v41 }
  0x31   :  { %415 = vmatpush.bf16.msra.mxu3 %v814_v28 }
  0x33   :  { %333 = vmatpush.bf16.msra.mxu2 %v805_v15 }
  0x34   :  { %251 = vmatpush.bf16.msra.mxu1 %v796_v8  ;;  %498 = vmatpush.bf16.msrb.mxu0 %v822_v42 }
  0x35   :  { %416 = vmatpush.bf16.msra.mxu3 %v813_v29 }
  0x37   :  { %334 = vmatpush.bf16.msra.mxu2 %v804_v16 }
  0x38   :  { %252 = vmatpush.bf16.msra.mxu1 %v795_v9  ;;  %499 = vmatpush.bf16.msrb.mxu0 %v821_v43  ;;  %v849_v9 = vld [vmem:[%s1178_s7 + $0x5] ss:$0 sm:$0xff]  ;;  %s610_s7 = sshll.u32 %s1179_s8, 4  ;;  %s611_s7 = int_to_ptr.hbm [resolvable:$true] %s610_s7 }
  0x39   :  { %417 = vmatpush.bf16.msra.mxu3 %v812_v30 }
  0x3b   :  { %335 = vmatpush.bf16.msra.mxu2 %v803_v23 }
  0x3c   :  { %253 = vmatpush.bf16.msra.mxu1 %v794_v10  ;;  %500 = vmatpush.bf16.msrb.mxu0 %v820_v44 }
  0x3d   :  { %418 = vmatpush.bf16.msra.mxu3 %v811_v37 }
  0x3f   :  { %336 = vmatpush.bf16.msra.mxu2 %v802_v24 }
  0x40   :  { %501 = vmatpush.bf16.msrb.mxu0 %v819_v51  ;;  %578 = vmatpush.bf16.msrb.mxu1 %v833_v53 }
  0x41   :  { %419 = vmatpush.bf16.msra.mxu3 %v810_v38 }
  0x44   :  { %502 = vmatpush.bf16.msrb.mxu0 %v818_v52  ;;  %579 = vmatpush.bf16.msrb.mxu1 %v832_v54 }
  0x48   :  { %580 = vmatpush.bf16.msrb.mxu1 %v831_v55 }
  0x4c   :  { %581 = vmatpush.bf16.msrb.mxu1 %v830_v56 }
  0x50   :  { %582 = vmatpush.bf16.msrb.mxu1 %v829_v57 }
  0x54   :  { %583 = vmatpush.bf16.msrb.mxu1 %v828_v58 }
  0x58   :  { %584 = vmatpush.bf16.msrb.mxu1 %v827_v1 }
  0x5c   :  { %585 = vmatpush.bf16.msrb.mxu1 %v826_v2 }
  0xa3   :  { %v172_v18 = vpop.f32.mrf.mxu0 }
  0xa4   :  { %v173_v19 = vadd.f32 %v844_v17, %v172_v18 }
  0xa6   :  { %v176_v20 = vmax.f32 %v173_v19, 0.0 }
  0xa8   :  { %v177_v21 = vpack.c.bf16 %v176_v20, %v176_v20 }
  0xaa   :  { %254 = vmatmul.bf16.vlgmr.msra.gmra.mxu1 %v177_v21 }
  0xab   :  { %v174_v22 = vpop.f32.mrf.mxu0 }
 0x127   :  { %v255_v32 = vpop.f32.mrf.mxu1 }
 0x128   :  { %v256_v33 = vadd.f32 %v845_v31, %v255_v32 }
 0x12a   :  { %v259_v34 = vmax.f32 %v256_v33, 0.0 }
 0x12c   :  { %v260_v35 = vpack.c.bf16 %v259_v34, %v259_v34 }
 0x12e   :  { %337 = vmatmul.bf16.vlgmr.msra.gmra.mxu2 %v260_v35 }
 0x12f   :  { %v257_v36 = vpop.f32.mrf.mxu1 }
 0x1b1   :  { %v338_v46 = vpop.f32.mrf.mxu2 }
 0x1b2   :  { %v339_v47 = vadd.f32 %v846_v45, %v338_v46 }
 0x1b4   :  { %v342_v48 = vmax.f32 %v339_v47, 0.0 }
 0x1b6   :  { %v343_v49 = vpack.c.bf16 %v342_v48, %v342_v48 }
 0x1b8   :  { %420 = vmatmul.bf16.vlgmr.msra.gmra.mxu3 %v343_v49 }
 0x1b9   :  { %v340_v50 = vpop.f32.mrf.mxu2 }
 0x23b   :  { %v421_v60 = vpop.f32.mrf.mxu3 }
 0x23c   :  { %v422_v61 = vadd.f32 %v847_v59, %v421_v60 }
 0x23e   :  { %v425_v62 = vmax.f32 %v422_v61, 0.0 }
 0x240   :  { %v426_v63 = vpack.c.bf16 %v425_v62, %v425_v62 }
 0x242   :  { %503 = vmatmul.bf16.vlgmr.msrb.gmra.mxu0 %v426_v63 }
 0x243   :  { %v423_v0 = vpop.f32.mrf.mxu3 }
 0x2bf   :  { %v504_v4 = vpop.f32.mrf.mxu0 }
 0x2c0   :  { %v505_v5 = vadd.f32 %v848_v3, %v504_v4 }
 0x2c2   :  { %v508_v6 = vmax.f32 %v505_v5, 0.0 }
 0x2c4   :  { %v509_v7 = vpack.c.bf16 %v508_v6, %v508_v6 }
 0x2c6   :  { %586 = vmatmul.bf16.vlgmr.msrb.gmra.mxu1 %v509_v7 }
 0x2c7   :  { %v506_v8 = vpop.f32.mrf.mxu0 }
 0x343   :  { %v587_v10 = vpop.f32.mrf.mxu1 }
 0x344   :  { %v588_v11 = vadd.f32 %v849_v9, %v587_v10 }
 0x346   :  { %591 = vmax.xlane.f32.xlu0 %v588_v11 }
 0x34b   :  { %v589_v12 = vpop.f32.mrf.mxu1 }
 0x3b9   :  { %v592_v13 = vpop.xlane.xlu0 %591 }
 0x3ba   :  { %v593_v14 = vsub.f32 %v588_v11, %v592_v13 }
 0x3bc   :  { %v594_v15 = vmul.f32 1.442695, %v593_v14 }
 0x3be   :  { %850 = vpow2.f32 %v594_v15 }
 0x3c4   :  { %v851_v16 = vpop.eup %850 }
 0x3c5   :  { %596 = vadd.xlane.f32.xlu0 %v851_v16 }
 0x438   :  { %v597_v17 = vpop.xlane.xlu0 %596 }
 0x439   :  { %852 = vlog2.f32 %v597_v17 }
 0x43f   :  { %v853_v18 = vpop.eup %852 }
 0x440   :  { %v599_v19 = vmul.f32 0.6931472, %v853_v18 }
 0x442   :  { %v600_v20 = vsub.f32 %v593_v14, %v599_v19 }
 0x444   :  { %v601_v21 = vpack.c.bf16 %v600_v20, %v600_v20 }
 0x446   :  { %602 = vst [vmem:[#allocation14] sm:$0xf] %v601_v21 }
 0x447   :  { %613 = dma.vmem_to_hbm [thread:$0]  %s609_s5, 64, %s611_s7, [#allocation4]  }
 0x448   :  { %1054 = dma.done.wait [#allocation4], 64  }
 0x449   :  { %1055 = vsyncadd [#allocation4], 4294967232 }
 0x44a   :  { %618 = vsyncpa [#allocation3], 1 }
 0x44b   :  { %619 = vsyncpa [#allocation6], 1 }
 0x44c   :  { %620 = vsyncpa [#allocation9], 1 }
 0x44d   :  { %621 = vsyncpa [#allocation12], 1 }
 0x44e   :  { %622 = vsyncpa [#allocation4], 1 }

</bundles_post_ra>
